<compile_context>
chip_gen: v7x
topology: tpu7x:2x2x1
jax: 0.10.0
libtpu: 0.0.40
codegen_flags: <defaults>
</compile_context>

<pallas_src>
import jax
import jax.numpy as jnp
from jax.experimental import pallas as pl
from jax.experimental.pallas import tpu as pltpu


def _round_up(x, m):
    return ((x + m - 1) // m) * m


def _vmem_capacity_bytes():
    try:
        return int(pltpu.get_tpu_info().vmem_capacity_bytes)
    except Exception:
        return 64 << 20  # conservative fallback (v7x per-TC VMEM)


def _compute_h(x_ref, w1_ref, b1_ref, w2_ref):
    # First matmul on the MXU with f32 accumulation, bias + ReLU on the VPU
    # in f32, then cast back to the weight dtype for the second MXU matmul.
    h = jnp.dot(x_ref[...], w1_ref[...], preferred_element_type=jnp.float32)
    h = jnp.maximum(h + b1_ref[...], 0.0)
    return h.astype(w2_ref.dtype)


def _ffn_kernel_accum_out(x_ref, w1_ref, b1_ref, w2_ref, b2_ref, o_ref):
    """f32 output path: accumulate directly into the resident output block."""
    k = pl.program_id(1)
    hc = _compute_h(x_ref, w1_ref, b1_ref, w2_ref)

    @pl.when(k == 0)
    def _():
        # b2-init + first partial product: no zero store, no final add pass.
        o_ref[...] = b2_ref[...] + jnp.dot(
            hc, w2_ref[...], preferred_element_type=jnp.float32)

    @pl.when(k > 0)
    def _():
        # Single fused expression (v7x MRB in-place accumulate).
        o_ref[...] += jnp.dot(hc, w2_ref[...], preferred_element_type=jnp.float32)


def _ffn_kernel_scratch(x_ref, w1_ref, b1_ref, w2_ref, b2_ref, o_ref, acc_ref):
    """Non-f32 output path: f32 scratch accumulator, cast once at last k."""
    k = pl.program_id(1)
    hc = _compute_h(x_ref, w1_ref, b1_ref, w2_ref)

    @pl.when(k == 0)
    def _():
        acc_ref[...] = b2_ref[...] + jnp.dot(
            hc, w2_ref[...], preferred_element_type=jnp.float32)

    @pl.when(k > 0)
    def _():
        acc_ref[...] += jnp.dot(hc, w2_ref[...], preferred_element_type=jnp.float32)

    @pl.when(k == pl.num_programs(1) - 1)
    def _():
        o_ref[...] = acc_ref[...].astype(o_ref.dtype)


def positionwise_feed_forward(x, w1, b1, w2, b2, *, tm=None, tk_ff=None,
                              compute_dtype=None):
    """x: (batch, seq, d_model) -> (batch, seq, d_model).

    Weights are stored transposed vs. PyTorch nn.Linear:
      w1: (d_model, d_ff), b1: (d_ff,), w2: (d_ff, d_model), b2: (d_model,)

    compute_dtype: optional dtype (e.g. jnp.bfloat16) used for x/W1/W2 on the
      MXU; biases and accumulation stay f32; the output keeps x's dtype.
    """
    batch, seq, d_model = x.shape
    d_ff = w1.shape[1]
    M = batch * seq

    out_dtype = x.dtype
    in_dtype = jnp.dtype(compute_dtype) if compute_dtype is not None else jnp.dtype(x.dtype)
    w_dtype = jnp.dtype(compute_dtype) if compute_dtype is not None else jnp.dtype(w1.dtype)

    in_isz = in_dtype.itemsize
    w_isz = w_dtype.itemsize
    out_isz = jnp.dtype(out_dtype).itemsize

    d_model_pad = _round_up(d_model, 128)          # lane-dense output tile

    use_direct_out = jnp.dtype(out_dtype) == jnp.dtype(jnp.float32)
    # Resident per-row-tile bytes: 2x x tiles, 2x out tiles (+ f32 acc scratch
    # only when the output dtype is not f32).
    per_row_factor = 2 * in_isz + 2 * out_isz + (0 if use_direct_out else 4)

    vmem_cap = _vmem_capacity_bytes()
    budget = int(vmem_cap * 0.85)

    # ---- per-generation tile targets, then fit into the VMEM budget --------
    if tm is None:
        tm = 1024 if vmem_cap >= (100 << 20) else 768
    if tk_ff is None:
        tk_ff = 512 if vmem_cap >= (100 << 20) else 256

    tm_eff = _round_up(min(tm, _round_up(M, 8)), 8)
    tk_nom = _round_up(min(tk_ff, _round_up(d_ff, 128)), 128)

    def _footprint(tm_, tk_):
        return (tm_ * d_model_pad * per_row_factor          # x / out / acc
                + 4 * tk_ * d_model_pad * w_isz              # 2x W1 + 2x W2 tiles
                + 2 * (tk_ + d_model_pad) * 4)               # bias tiles (f32)

    while _footprint(tm_eff, tk_nom) > budget and tk_nom > 128:
        tk_nom = max(128, tk_nom // 2)
    while _footprint(tm_eff, tk_nom) > budget and tm_eff > 8:
        tm_eff = max(8, _round_up(tm_eff // 2, 8))

    M_pad = _round_up(M, tm_eff)

    if tk_nom >= d_ff:
        tk_eff = d_ff                      # single reduction step (full extent)
        d_ff_pad = d_ff
    else:
        tk_eff = tk_nom                    # lane-aligned d_ff tile
        d_ff_pad = _round_up(d_ff, tk_eff)

    # ---- pad / cast operands (zero padding is exact for this FFN); skip the
    # ---- pad entirely when shapes are already aligned (no weight HBM copy).
    x2d = x.reshape(M, d_model)
    if x2d.dtype != in_dtype:
        x2d = x2d.astype(in_dtype)
    if (M_pad, d_model_pad) != (M, d_model):
        x2d = jnp.pad(x2d, ((0, M_pad - M), (0, d_model_pad - d_model)))

    w1_p = w1.astype(w_dtype) if w1.dtype != w_dtype else w1
    if w1_p.shape != (d_model_pad, d_ff_pad):
        w1_p = jnp.pad(w1_p, ((0, d_model_pad - d_model), (0, d_ff_pad - d_ff)))
    w2_p = w2.astype(w_dtype) if w2.dtype != w_dtype else w2
    if w2_p.shape != (d_ff_pad, d_model_pad):
        w2_p = jnp.pad(w2_p, ((0, d_ff_pad - d_ff), (0, d_model_pad - d_model)))

    b1_p = b1.astype(jnp.float32)
    if d_ff_pad != d_ff:
        b1_p = jnp.pad(b1_p, (0, d_ff_pad - d_ff))
    b1_p = b1_p.reshape(1, d_ff_pad)

    b2_p = b2.astype(jnp.float32)
    if d_model_pad != d_model:
        b2_p = jnp.pad(b2_p, (0, d_model_pad - d_model))
    b2_p = b2_p.reshape(1, d_model_pad)

    grid = (M_pad // tm_eff, d_ff_pad // tk_eff)
    num_row_tiles = grid[0]

    # ---- VMEM limit: actual footprint + headroom, clamped to physical VMEM --
    footprint = _footprint(tm_eff, tk_eff)
    vmem_limit = min(max(int(footprint * 1.3) + (1 << 20), 32 << 20), vmem_cap)

    # ---- cost estimate: W1/W2 are re-streamed once per row tile -------------
    cost = pl.CostEstimate(
        flops=4 * M_pad * d_model_pad * d_ff_pad,
        transcendentals=0,
        bytes_accessed=(
            M_pad * d_model_pad * (in_isz + out_isz)                     # x + out
            + num_row_tiles * (w1_p.size + w2_p.size) * w_isz            # weights
            + num_row_tiles * (b1_p.size + b2_p.size) * 4                # biases
        ),
    )

    if use_direct_out:
        kernel = _ffn_kernel_accum_out
        scratch_shapes = []
    else:
        kernel = _ffn_kernel_scratch
        scratch_shapes = [pltpu.VMEM((tm_eff, d_model_pad), jnp.float32)]

    out2d = pl.pallas_call(
        kernel,
        out_shape=jax.ShapeDtypeStruct((M_pad, d_model_pad), out_dtype),
        grid_spec=pltpu.PrefetchScalarGridSpec(
            num_scalar_prefetch=0,
            grid=grid,
            in_specs=[
                pl.BlockSpec((tm_eff, d_model_pad), lambda i, k: (i, 0)),   # x rows
                pl.BlockSpec((d_model_pad, tk_eff), lambda i, k: (0, k)),   # W1 slice
                pl.BlockSpec((1, tk_eff), lambda i, k: (0, k)),             # b1 slice
                pl.BlockSpec((tk_eff, d_model_pad), lambda i, k: (k, 0)),   # W2 slice
                pl.BlockSpec((1, d_model_pad), lambda i, k: (0, 0)),        # b2
            ],
            out_specs=pl.BlockSpec((tm_eff, d_model_pad), lambda i, k: (i, 0)),
            scratch_shapes=scratch_shapes,
        ),
        compiler_params=pltpu.CompilerParams(
            dimension_semantics=("parallel", "arbitrary"),
            vmem_limit_bytes=vmem_limit,
        ),
        cost_estimate=cost,
    )(x2d, w1_p, b1_p, w2_p, b2_p)

    return out2d[:M, :d_model].reshape(batch, seq, d_model)


if __name__ == "__main__":
    def _ref(x, w1, b1, w2, b2):
        return jnp.maximum(x @ w1 + b1, 0.0) @ w2 + b2

    keys = jax.random.split(jax.random.PRNGKey(0), 15)

    # ---- config 1: small f32, single-step d_ff reduction --------------------
    batch, seq, d_model, d_ff = 2, 8, 32, 64
    x = jax.random.normal(keys[0], (batch, seq, d_model), dtype=jnp.float32)
    w1 = jax.random.normal(keys[1], (d_model, d_ff), dtype=jnp.float32) * 0.1
    b1 = jax.random.normal(keys[2], (d_ff,), dtype=jnp.float32) * 0.1
    w2 = jax.random.normal(keys[3], (d_ff, d_model), dtype=jnp.float32) * 0.1
    b2 = jax.random.normal(keys[4], (d_model,), dtype=jnp.float32) * 0.1

    out = jax.block_until_ready(positionwise_feed_forward(x, w1, b1, w2, b2))
    assert out.shape == (batch, seq, d_model)
    assert jnp.allclose(out, _ref(x, w1, b1, w2, b2), atol=1e-4, rtol=1e-4), \
        "mismatch vs reference (config 1)"

    # ---- config 2: f32, padding + multi-step d_ff reduction (direct-out path)
    batch2, seq2, d_model2, d_ff2 = 2, 21, 48, 320
    x2 = jax.random.normal(keys[5], (batch2, seq2, d_model2), dtype=jnp.float32)
    w1b = jax.random.normal(keys[6], (d_model2, d_ff2), dtype=jnp.float32) * 0.1
    b1b = jax.random.normal(keys[7], (d_ff2,), dtype=jnp.float32) * 0.1
    w2b = jax.random.normal(keys[8], (d_ff2, d_model2), dtype=jnp.float32) * 0.1
    b2b = jax.random.normal(keys[9], (d_model2,), dtype=jnp.float32) * 0.1

    out2 = jax.block_until_ready(
        positionwise_feed_forward(x2, w1b, b1b, w2b, b2b, tm=32, tk_ff=128))
    assert out2.shape == (batch2, seq2, d_model2)
    assert jnp.allclose(out2, _ref(x2, w1b, b1b, w2b, b2b), atol=1e-4, rtol=1e-4), \
        "mismatch vs reference (config 2)"

    # ---- config 3: bf16, multi-step d_ff reduction (f32-scratch path) --------
    batch3, seq3, d_model3, d_ff3 = 2, 12, 64, 384
    x3 = (jax.random.normal(keys[10], (batch3, seq3, d_model3), jnp.float32)
          ).astype(jnp.bfloat16)
    w1c = (jax.random.normal(keys[11], (d_model3, d_ff3), jnp.float32) * 0.1
           ).astype(jnp.bfloat16)
    b1c = (jax.random.normal(keys[12], (d_ff3,), jnp.float32) * 0.1
           ).astype(jnp.bfloat16)
    w2c = (jax.random.normal(keys[13], (d_ff3, d_model3), jnp.float32) * 0.1
           ).astype(jnp.bfloat16)
    b2c = (jax.random.normal(keys[14], (d_model3,), jnp.float32) * 0.1
           ).astype(jnp.bfloat16)

    out3 = jax.block_until_ready(
        positionwise_feed_forward(x3, w1c, b1c, w2c, b2c, tm=64, tk_ff=128))
    assert out3.shape == (batch3, seq3, d_model3)
    assert out3.dtype == jnp.bfloat16
    ref3 = _ref(x3.astype(jnp.float32), w1c.astype(jnp.float32),
                b1c.astype(jnp.float32), w2c.astype(jnp.float32),
                b2c.astype(jnp.float32))
    assert jnp.allclose(out3.astype(jnp.float32), ref3, atol=0.1, rtol=0.1), \
        "mismatch vs reference (config 3, bf16)"

    print("KERNEL_OK")
</pallas_src>

<mosaic_0001>
module attributes {stable_mosaic.version = 11 : i64} {
  func.func @_ffn_kernel_accum_out(%arg0: i32, %arg1: i32, %arg2: memref<16x128xf32, #tpu.memory_space<vmem>>, %arg3: memref<128x64xf32, #tpu.memory_space<vmem>>, %arg4: memref<1x64xf32, #tpu.memory_space<vmem>>, %arg5: memref<64x128xf32, #tpu.memory_space<vmem>>, %arg6: memref<1x128xf32, #tpu.memory_space<vmem>>, %arg7: memref<16x128xf32, #tpu.memory_space<vmem>>) attributes {dimension_semantics = [#tpu.dimension_semantics<parallel>, #tpu.dimension_semantics<arbitrary>], iteration_bounds = array<i64: 1, 1>, scalar_prefetch = 0 : i64, scratch_operands = 0 : i64, tpu.core_type = #tpu.core_type<tc>, window_params = [{transform_indices = @transform_0, window_bounds = array<i64: 16, 128>}, {transform_indices = @transform_1, window_bounds = array<i64: 128, 64>}, {transform_indices = @transform_2, window_bounds = array<i64: 1, 64>}, {transform_indices = @transform_3, window_bounds = array<i64: 64, 128>}, {pipeline_mode = #tpu.pipeline_mode<synchronous>, transform_indices = @transform_4, window_bounds = array<i64: 1, 128>}, {transform_indices = @transform_5, window_bounds = array<i64: 16, 128>}]} {
    %c0 = arith.constant 0 : index
    %c0_0 = arith.constant 0 : index
    %0 = vector.load %arg2[%c0, %c0_0] : memref<16x128xf32, #tpu.memory_space<vmem>>, vector<16x128xf32>
    %c0_1 = arith.constant 0 : index
    %c0_2 = arith.constant 0 : index
    %1 = vector.load %arg3[%c0_1, %c0_2] : memref<128x64xf32, #tpu.memory_space<vmem>>, vector<128x64xf32>
    %cst = arith.constant dense<0.000000e+00> : vector<16x64xf32>
    %2 = tpu.matmul %0, %1, %cst {dimension_numbers = #tpu.dot_dimension_numbers<[1], [0], [0], [1], [0, 0, 1, 1], [], []>} : vector<16x128xf32>, vector<128x64xf32>, vector<16x64xf32> -> vector<16x64xf32>
    %c0_3 = arith.constant 0 : index
    %c0_4 = arith.constant 0 : index
    %3 = vector.load %arg4[%c0_3, %c0_4] : memref<1x64xf32, #tpu.memory_space<vmem>>, vector<1x64xf32>
    %4 = vector.broadcast %3 : vector<1x64xf32> to vector<16x64xf32>
    %5 = arith.addf %2, %4 : vector<16x64xf32>
    %cst_5 = arith.constant 0.000000e+00 : f32
    %6 = vector.broadcast %cst_5 : f32 to vector<16x64xf32>
    %7 = arith.maximumf %5, %6 : vector<16x64xf32>
    %c0_i32 = arith.constant 0 : i32
    %8 = arith.cmpi eq, %arg1, %c0_i32 : i32
    %9 = arith.extui %8 : i1 to i32
    %c0_i32_6 = arith.constant 0 : i32
    %10 = arith.cmpi ne, %9, %c0_i32_6 : i32
    scf.if %10 {
      %c0_9 = arith.constant 0 : index
      %c0_10 = arith.constant 0 : index
      %14 = vector.load %arg6[%c0_9, %c0_10] : memref<1x128xf32, #tpu.memory_space<vmem>>, vector<1x128xf32>
      %c0_11 = arith.constant 0 : index
      %c0_12 = arith.constant 0 : index
      %15 = vector.load %arg5[%c0_11, %c0_12] : memref<64x128xf32, #tpu.memory_space<vmem>>, vector<64x128xf32>
      %cst_13 = arith.constant dense<0.000000e+00> : vector<16x128xf32>
      %16 = tpu.matmul %7, %15, %cst_13 {dimension_numbers = #tpu.dot_dimension_numbers<[1], [0], [0], [1], [0, 0, 1, 1], [], []>} : vector<16x64xf32>, vector<64x128xf32>, vector<16x128xf32> -> vector<16x128xf32>
      %17 = vector.broadcast %14 : vector<1x128xf32> to vector<16x128xf32>
      %18 = arith.addf %17, %16 : vector<16x128xf32>
      %c0_14 = arith.constant 0 : index
      %c0_15 = arith.constant 0 : index
      %19 = vector.load %arg7[%c0_14, %c0_15] : memref<16x128xf32, #tpu.memory_space<vmem>>, vector<16x128xf32>
      tpu.vector_store %arg7[%c0_14, %c0_15], %18 {strides = array<i32>} : memref<16x128xf32, #tpu.memory_space<vmem>>, vector<16x128xf32>,
    } else {
    }
    %c0_i32_7 = arith.constant 0 : i32
    %11 = arith.cmpi sgt, %arg1, %c0_i32_7 : i32
    %12 = arith.extui %11 : i1 to i32
    %c0_i32_8 = arith.constant 0 : i32
    %13 = arith.cmpi ne, %12, %c0_i32_8 : i32
    scf.if %13 {
      %c0_9 = arith.constant 0 : index
      %c0_10 = arith.constant 0 : index
      %14 = vector.load %arg7[%c0_9, %c0_10] : memref<16x128xf32, #tpu.memory_space<vmem>>, vector<16x128xf32>
      %c0_11 = arith.constant 0 : index
      %c0_12 = arith.constant 0 : index
      %15 = vector.load %arg5[%c0_11, %c0_12] : memref<64x128xf32, #tpu.memory_space<vmem>>, vector<64x128xf32>
      %cst_13 = arith.constant dense<0.000000e+00> : vector<16x128xf32>
      %16 = tpu.matmul %7, %15, %cst_13 {dimension_numbers = #tpu.dot_dimension_numbers<[1], [0], [0], [1], [0, 0, 1, 1], [], []>} : vector<16x64xf32>, vector<64x128xf32>, vector<16x128xf32> -> vector<16x128xf32>
      %17 = arith.addf %14, %16 : vector<16x128xf32>
      %c0_14 = arith.constant 0 : index
      %c0_15 = arith.constant 0 : index
      %18 = vector.load %arg7[%c0_14, %c0_15] : memref<16x128xf32, #tpu.memory_space<vmem>>, vector<16x128xf32>
      tpu.vector_store %arg7[%c0_14, %c0_15], %17 {strides = array<i32>} : memref<16x128xf32, #tpu.memory_space<vmem>>, vector<16x128xf32>,
    } else {
    }
    return
  }
  func.func @transform_0(%arg0: i32, %arg1: i32) -> (i32, i32) {
    %c0_i32 = arith.constant 0 : i32
    %c0_i32_0 = arith.constant 0 : i32
    return %arg0, %c0_i32 : i32, i32
  }
  func.func @transform_1(%arg0: i32, %arg1: i32) -> (i32, i32) {
    %c0_i32 = arith.constant 0 : i32
    %c0_i32_0 = arith.constant 0 : i32
    return %c0_i32, %arg1 : i32, i32
  }
  func.func @transform_2(%arg0: i32, %arg1: i32) -> (i32, i32) {
    %c0_i32 = arith.constant 0 : i32
    %c0_i32_0 = arith.constant 0 : i32
    return %c0_i32, %arg1 : i32, i32
  }
  func.func @transform_3(%arg0: i32, %arg1: i32) -> (i32, i32) {
    %c0_i32 = arith.constant 0 : i32
    %c0_i32_0 = arith.constant 0 : i32
    return %arg1, %c0_i32 : i32, i32
  }
  func.func @transform_4(%arg0: i32, %arg1: i32) -> (i32, i32) {
    %c0_i32 = arith.constant 0 : i32
    %c0_i32_0 = arith.constant 0 : i32
    %c0_i32_1 = arith.constant 0 : i32
    return %c0_i32, %c0_i32_0 : i32, i32
  }
  func.func @transform_5(%arg0: i32, %arg1: i32) -> (i32, i32) {
    %c0_i32 = arith.constant 0 : i32
    %c0_i32_0 = arith.constant 0 : i32
    return %arg0, %c0_i32 : i32, i32
  }
}

</mosaic_0001>

<bundles_post_ra>
// kernel: tpu_custom_call.1
= control target key start
LH: loop header
LB: loop body
LE: loop exit
PB: predicated region body
PF: predicated region fallthrough
CT: control target
= control target key end

     0   :  { %s636_s0 = inlined_call_operand.vmem [shape: f32[16,128], index: 0, kind: input, shape index: {}]   ;;  %s637_s1 = inlined_call_operand.vmem [shape: f32[128,64], index: 1, kind: input, shape index: {}]   ;;  %s638_s2 = inlined_call_operand.vmem [shape: f32[1,64], index: 2, kind: input, shape index: {}]   ;;  %s639_s3 = inlined_call_operand.vmem [shape: f32[64,128], index: 3, kind: input, shape index: {}]   ;;  %s640_s4 = inlined_call_operand.vmem [shape: f32[1,128], index: 4, kind: input, shape index: {}]   ;;  %s641_s5 = inlined_call_operand.hbm [shape: f32[16,128], index: 5, kind: output, shape index: {}]  }
   0x1   :  { %v23_v0 = vld [vmem:[%s637_s1] sm:$0xff]  ;;  %v24_v1 = vld [vmem:[%s637_s1 + $0x8] sm:$0xff]  ;;  %v25_v2 = vld [vmem:[%s637_s1 + $0x10] sm:$0xff] }
   0x2   :  { %v432_v3 = vpack.c.bf16 %v24_v1, %v23_v0  ;;  %v26_v4 = vld [vmem:[%s637_s1 + $0x18] sm:$0xff]  ;;  %v27_v6 = vld [vmem:[%s637_s1 + $0x20] sm:$0xff]  ;;  %v28_v7 = vld [vmem:[%s637_s1 + $0x28] sm:$0xff] }
   0x3   :  { %v436_v5 = vpack.c.bf16 %v26_v4, %v25_v2  ;;  %v440_v8 = vpack.c.bf16 %v28_v7, %v27_v6  ;;  %v29_v9 = vld [vmem:[%s637_s1 + $0x30] sm:$0xff]  ;;  %v30_v10 = vld [vmem:[%s637_s1 + $0x38] sm:$0xff]  ;;  %v21_v11 = vld [vmem:[%s636_s0] sm:$0xff] }
   0x4   :  { %433 = vmatprep.subr.bf16.mxu0 %v432_v3  ;;  %410 = vmatprep.mubr.f32.mxu0 %v21_v11  ;;  %v128_v12 = vld [vmem:[%s639_s3] sm:$0xff]  ;;  %v129_v13 = vld [vmem:[%s639_s3 + $0x8] sm:$0xff]  ;;  %v130_v14 = vld [vmem:[%s639_s3 + $0x10] sm:$0xff] }
   0x5   :  { %435 = vmatpush3.bf16.msra.mxu0 %v432_v3  ;;  %v464_v15 = vpack.c.bf16 %v129_v13, %v128_v12  ;;  %v131_v16 = vld [vmem:[%s639_s3 + $0x18] sm:$0xff]  ;;  %v132_v18 = vld [vmem:[%s639_s3 + $0x20] sm:$0xff]  ;;  %v133_v19 = vld [vmem:[%s639_s3 + $0x28] sm:$0xff] }
   0x6   :  { %437 = vmatprep.subr.bf16.mxu0 %v436_v5  ;;  %v468_v17 = vpack.c.bf16 %v131_v16, %v130_v14 }
   0x9   :  { %439 = vmatpush3.bf16.msra.mxu0 %v436_v5 }
   0xa   :  { %10 = vsyncpa [#allocation3], 0  ;;  %441 = vmatprep.subr.bf16.mxu0 %v440_v8  ;;  %v444_v20 = vpack.c.bf16 %v30_v10, %v29_v9  ;;  %465 = vmatprep.subr.bf16.mxu1 %v464_v15  ;;  %v31_v21 = vld [vmem:[%s637_s1 + $0x40] sm:$0xff]  ;;  %v32_v22 = vld [vmem:[%s637_s1 + $0x48] sm:$0xff]  ;;  %v472_v23 = vpack.c.bf16 %v133_v19, %v132_v18  ;;  %vm136_vm0 = vcmask 523264  }
   0xb   :  { %467 = vmatpush3.bf16.msra.mxu1 %v464_v15  ;;  %v448_v24 = vpack.c.bf16 %v32_v22, %v31_v21  ;;  %v33_v25 = vld [vmem:[%s637_s1 + $0x50] sm:$0xff]  ;;  %v34_v26 = vld [vmem:[%s637_s1 + $0x58] sm:$0xff]  ;;  %v35_v28 = vld [vmem:[%s637_s1 + $0x60] sm:$0xff] }
   0xc   :  { %469 = vmatprep.subr.bf16.mxu1 %v468_v17  ;;  %v452_v27 = vpack.c.bf16 %v34_v26, %v33_v25  ;;  %v36_v29 = vld [vmem:[%s637_s1 + $0x68] sm:$0xff]  ;;  %v37_v31 = vld [vmem:[%s637_s1 + $0x70] sm:$0xff]  ;;  %v38_v32 = vld [vmem:[%s637_s1 + $0x78] sm:$0xff] }
   0xd   :  { %443 = vmatpush3.bf16.msra.mxu0 %v440_v8  ;;  %v456_v30 = vpack.c.bf16 %v36_v29, %v35_v28  ;;  %v460_v33 = vpack.c.bf16 %v38_v32, %v37_v31  ;;  %v22_v34 = vld [vmem:[%s636_s0 + $0x8] sm:$0xff]  ;;  %v134_v35 = vld [vmem:[%s639_s3 + $0x30] sm:$0xff]  ;;  %v135_v36 = vld [vmem:[%s639_s3 + $0x38] sm:$0xff]  ;;  %s507_s3 = smov [#allocation2]  }
   0xe   :  { %445 = vmatprep.subr.bf16.mxu0 %v444_v20  ;;  %v476_v37 = vpack.c.bf16 %v135_v36, %v134_v35  ;;  %v344_v38 = vld [vmem:[%s638_s2] ss:$0 sm:$0xff]  ;;  %s333_s22 = sshll.u32 %s507_s3, 4  ;;  %s334_s22 = int_to_ptr.vmem [resolvable:$true] %s333_s22 }
   0xf   :  { %471 = vmatpush3.bf16.msra.mxu1 %v468_v17  ;;  %v347_v45 = vld [vmem:[%s640_s4] ss:$0 sm:$0xff]  ;;  %s483_s2 = scalar_lea.vmem %s334_s22, 256  ;;  %p488_p1 = scmp.lt.s32.totalorder %s334_s22, %s334_s22 }
  0x10   :  { %473 = vmatprep.subr.bf16.mxu1 %v472_v23  ;;  %p484_p0 = scmp.ne.s32.totalorder %s334_s22, %s483_s2  ;;  %p489_p2 = scmp.lt.s32.totalorder %s483_s2, %s483_s2 }
  0x11   :  { %447 = vmatpush3.bf16.msra.mxu0 %v444_v20 }
  0x12   :  { %449 = vmatprep.subr.bf16.mxu0 %v448_v24  ;;  %p490_p3 = por %p489_p2, %p488_p1 }
  0x13   :  { %475 = vmatpush3.bf16.msra.mxu1 %v472_v23 }
  0x14   :  { %477 = vmatprep.subr.bf16.mxu1 %v476_v37  ;;  %p491_p4 = pnand %p490_p3, %p484_p0 }
  0x15   :  { %451 = vmatpush3.bf16.msra.mxu0 %v448_v24 }
  0x16   :  { %453 = vmatprep.subr.bf16.mxu0 %v452_v27 }
  0x17   :  { %479 = vmatpush3.bf16.msra.mxu1 %v476_v37 }
  0x19   :  { %455 = vmatpush3.bf16.msra.mxu0 %v452_v27 }
  0x1a   :  { %457 = vmatprep.subr.bf16.mxu0 %v456_v30 }
  0x1d   :  { %459 = vmatpush3.bf16.msra.mxu0 %v456_v30 }
  0x1e   :  { %461 = vmatprep.subr.bf16.mxu0 %v460_v33 }
  0x21   :  { %463 = vmatpush3.bf16.msra.mxu0 %v460_v33 }
  0x24   :  { %411 = vmatmul.mubr.f32.vlgmr.msra.gmra.mrb[0].mxu0 %v22_v34 }
  0xf7   :  { %v412_v39 = vpop.f32.mrb[0].mxu0 }
  0xf8   :  { %v118_v40 = vadd.f32 %v412_v39, %v344_v38  ;;  %v112_v41 = vpop.f32.mrb[1].mxu0 }
  0xf9   :  { %v113_v42 = vadd.f32 %v344_v38, %v112_v41 }
  0xfa   :  { %v122_v44 = vmax.f32 %v118_v40, 0.0 }
  0xfb   :  { %v121_v43 = vmax.f32 %v113_v42, 0.0 }
  0xfd   :  { %429 = vmatprep.mubr.msk.f32.mxu1 %vm136_vm0, %v121_v43 }
  0xfe   :  { %430 = vmatmul.mubr.msk.f32.vlgmr.msra.gmra.mrb[0].mxu1 %vm136_vm0, %v122_v44 }
 0x1d1   :  { %v431_v46 = vpop.f32.mrb[0].mxu1 }
 0x1d2   :  { %v225_v47 = vadd.f32 %v431_v46, %v347_v45  ;;  %v209_v48 = vpop.f32.mrb[1].mxu1 }
 0x1d3   :  { %v224_v49 = vadd.f32 %v347_v45, %v209_v48 }
 0x1d4   :  { %227 = vst [vmem:[#allocation2 + $0x8] sm:$0xff] %v225_v47 }
 0x1d5   :  { %226 = vst [vmem:[#allocation2] sm:$0xff] %v224_v49 }
 0x1d6   :  { %494 = shalt.err (!%p491_p4)
}
 0x1d7   :  { %s495_s4 = scalar_lea.hbm %s641_s5, 256 }
 0x1d8   :  { %p496_p5 = scmp.ne.s32.totalorder %s641_s5, %s495_s4  ;;  %p499_p6 = scmp.lt.u32.totalorder %s495_s4, %s641_s5 }
 0x1da   :  { %p501_p7 = pnand %p499_p6, %p496_p5 }
 0x1dc   :  { %504 = shalt.err (!%p501_p7)
}
 0x1dd   :  { %s508_s29 = smov 128   ;;  %s509_s30 = smov 8  }
 0x1de   :  { %339 = dma.vmem_to_hbm [thread:$0]  %s334_s22, 256, %s641_s5, [#allocation3], %s508_s29, %s508_s29, %s509_s30  }
 0x1df   :  { %505 = dma.done.wait [#allocation3], 256  }
 0x1e0   :  { %506 = vsyncadd [#allocation3], 4294967040 }
 0x1e1   :  { %343 = vsyncpa [#allocation3], 1 }

</bundles_post_ra>
